<compile_context>
chip_gen: v7x
topology: tpu7x:2x2x1
jax: 0.10.0
libtpu: 0.0.40
codegen_flags: <defaults>
</compile_context>

<pallas_src>
import functools

import jax
import jax.numpy as jnp
from jax.experimental import pallas as pl
from jax.experimental.pallas import tpu as pltpu


def _make_divisible(ch, divisor=8, min_ch=None):
    if min_ch is None:
        min_ch = divisor
    new_ch = max(min_ch, int(ch + divisor / 2) // divisor * divisor)
    if new_ch < 0.9 * ch:
        new_ch += divisor
    return new_ch


def _round_down(x, m):
    return (x // m) * m


def _vmem_capacity_bytes():
    try:
        return int(pltpu.get_tpu_info().vmem_capacity_bytes)
    except Exception:
        return 64 << 20  # conservative: v7x per-TensorCore VMEM


def _choose_batch_tile(n, per_img_bytes, budget_bytes, *, min_grid=4,
                       min_block_bytes=1 << 20):
    """Batch tile for the single-pass kernel.

    Priorities: (1) in+out double-buffered blocks fit the live-VMEM budget,
    (2) blocks stay >= ~1 MiB so the ~0.35us/step pipeline overhead amortizes,
    (3) the grid has >= min_grid steps (>=2 per v7x TensorCore) when N allows.
    Ragged last tiles are allowed (no N % bt requirement)."""
    bt_cap = max(1, budget_bytes // (4 * per_img_bytes))
    bt_grid = max(1, pl.cdiv(n, min_grid))
    bt_floor = max(1, pl.cdiv(min_block_bytes, per_img_bytes))
    return max(1, min(n, bt_cap, max(bt_grid, bt_floor)))


# --------------------------- single-pass kernel ------------------------------

def _se_kernel(x_ref, w1t_ref, b1_ref, w2t_ref, b2_ref, o_ref, *, hw: int):
    # x_ref: (bt, C, HW); w1t: (C, Cs); b1: (1, Cs); w2t: (Cs, C); b2: (1, C)
    x = x_ref[...]
    # adaptive_avg_pool2d == mean over spatial; f32-accumulating reduce (no f32
    # copy of the activation block).  Result (bt, C), channels on lanes.
    mean = jnp.sum(x, axis=2, dtype=jnp.float32) * (1.0 / hw)
    # fc1 (1x1 conv) + ReLU
    h = jnp.dot(mean, w1t_ref[...], preferred_element_type=jnp.float32) + b1_ref[...]
    h = jnp.maximum(h, 0.0)
    # fc2 (1x1 conv) + hardsigmoid = clip((x+3)/6, 0, 1)
    s = jnp.dot(h, w2t_ref[...], preferred_element_type=jnp.float32) + b2_ref[...]
    s = jnp.clip((s + 3.0) * (1.0 / 6.0), 0.0, 1.0)
    # Gate: broadcast per-(image, channel) scale over the spatial (lane) axis.
    o_ref[...] = x * s[:, :, None].astype(x.dtype)


# ------------------------ two-pass (HW-tiled) kernels ------------------------

def _se_scale_kernel(x_ref, w1t_ref, b1_ref, w2t_ref, b2_ref, scale_ref, acc_ref,
                     *, hw: int, thw: int, needs_mask: bool):
    # grid = (N, nhw); accumulate the pooled sum over HW tiles, finalize on last.
    j = pl.program_id(1)

    @pl.when(j == 0)
    def _():
        acc_ref[...] = jnp.zeros_like(acc_ref)

    x = x_ref[...]                                  # (1, C, thw)
    if needs_mask:
        col = jax.lax.broadcasted_iota(jnp.int32, x.shape, 2) + j * thw
        x = jnp.where(col < hw, x, jnp.zeros((), x.dtype))
    acc_ref[...] += jnp.sum(x, axis=2, dtype=jnp.float32)   # (1, C)

    @pl.when(j == pl.num_programs(1) - 1)
    def _():
        mean = acc_ref[...] * (1.0 / hw)                               # (1, C)
        h = jnp.dot(mean, w1t_ref[...],
                    preferred_element_type=jnp.float32) + b1_ref[...]  # (1, Cs)
        h = jnp.maximum(h, 0.0)
        s = jnp.dot(h, w2t_ref[...],
                    preferred_element_type=jnp.float32) + b2_ref[...]  # (1, C)
        s = jnp.clip((s + 3.0) * (1.0 / 6.0), 0.0, 1.0)
        scale_ref[...] = s[:, :, None]                                 # (1, C, 1)


def _se_gate_kernel(x_ref, scale_ref, o_ref):
    x = x_ref[...]                                   # (1, C, thw)
    o_ref[...] = x * scale_ref[...].astype(x.dtype)  # (1, C, 1) bcast over lanes


# --------------------------------- wrapper -----------------------------------

def squeeze_excitation(x_nchw, w1, b1, w2, b2, *,
                       live_vmem_budget_bytes=None, alias_input=False):
    """x_nchw: (N, C, H, W). w1: (Cs, C), b1: (Cs,), w2: (C, Cs), b2: (C,).
    Returns (N, C, H, W) with the same dtype as x_nchw."""
    n, c, h, w = x_nchw.shape
    hw = h * w
    cs = w1.shape[0]
    dtype = x_nchw.dtype
    itemsize = jnp.dtype(dtype).itemsize

    cap = _vmem_capacity_bytes()
    if live_vmem_budget_bytes is None:
        # ~16 MiB on 64 MiB parts (v7x), ~48 MiB on 128 MiB parts (v5e/v6e).
        live_vmem_budget_bytes = max(16 << 20, min(56 << 20, cap // 2 - (16 << 20)))
    vmem_hard_cap = max(16 << 20, cap - (8 << 20))

    # NCHW stays NCHW: (N, C, HW) is a free contiguous reshape; no HBM transpose.
    # TODO(synk): if the surrounding model is NHWC, accept (N, HW, C) directly for
    # fully lane-dense stores instead of the masked-store NCHW path.
    x_flat = x_nchw.reshape(n, c, hw)
    w1t = w1.T                     # (C, Cs)
    w2t = w2.T                     # (Cs, C)
    b1r = b1.reshape(1, cs)
    b2r = b2.reshape(1, c)
    weight_bytes = sum(int(a.size) * jnp.dtype(a.dtype).itemsize
                       for a in (w1t, w2t, b1r, b2r))

    per_img_bytes = c * hw * itemsize
    io_alias = {0: 0} if alias_input else {}

    if 4 * per_img_bytes <= live_vmem_budget_bytes:
        # ------------------------- single-pass path --------------------------
        bt = _choose_batch_tile(n, per_img_bytes, live_vmem_budget_bytes)
        grid = (pl.cdiv(n, bt),)
        block_bytes = bt * per_img_bytes
        vmem_limit = int(min(max(4 * block_bytes + 2 * weight_bytes + (4 << 20),
                                 16 << 20), vmem_hard_cap))
        cost = pl.CostEstimate(
            flops=int(2 * n * c * hw + 4 * n * c * cs),
            transcendentals=0,
            bytes_accessed=int(2 * n * c * hw * itemsize + weight_bytes))
        out = pl.pallas_call(
            functools.partial(_se_kernel, hw=hw),
            out_shape=jax.ShapeDtypeStruct((n, c, hw), dtype),
            grid_spec=pltpu.PrefetchScalarGridSpec(
                num_scalar_prefetch=0,
                grid=grid,
                in_specs=[
                    pl.BlockSpec((bt, c, hw), lambda i: (i, 0, 0)),
                    pl.BlockSpec((c, cs), lambda i: (0, 0)),
                    pl.BlockSpec((1, cs), lambda i: (0, 0)),
                    pl.BlockSpec((cs, c), lambda i: (0, 0)),
                    pl.BlockSpec((1, c), lambda i: (0, 0)),
                ],
                out_specs=pl.BlockSpec((bt, c, hw), lambda i: (i, 0, 0)),
            ),
            compiler_params=pltpu.CompilerParams(
                dimension_semantics=("parallel",),
                vmem_limit_bytes=vmem_limit),
            cost_estimate=cost,
            input_output_aliases=io_alias,
        )(x_flat, w1t, b1r, w2t, b2r)
    else:
        # ----------------- two-pass HW-tiled path (large images) -------------
        target_block_bytes = 4 << 20
        thw = min(target_block_bytes // (c * itemsize),
                  live_vmem_budget_bytes // (4 * c * itemsize))
        thw = max(128, _round_down(int(thw), 128))
        if thw >= hw:
            thw = hw
        nhw = pl.cdiv(hw, thw)
        needs_mask = (hw % thw) != 0
        block_bytes = c * thw * itemsize
        vmem_limit = int(min(max(4 * block_bytes + 2 * weight_bytes + (4 << 20),
                                 16 << 20), vmem_hard_cap))

        # Pass A: pooled mean -> fc1 -> ReLU -> fc2 -> hardsigmoid => (N, C, 1) f32
        cost_a = pl.CostEstimate(
            flops=int(n * c * hw + 4 * n * c * cs),
            transcendentals=0,
            bytes_accessed=int(n * c * hw * itemsize + weight_bytes))
        scale = pl.pallas_call(
            functools.partial(_se_scale_kernel, hw=hw, thw=thw,
                              needs_mask=needs_mask),
            out_shape=jax.ShapeDtypeStruct((n, c, 1), jnp.float32),
            grid_spec=pltpu.PrefetchScalarGridSpec(
                num_scalar_prefetch=0,
                grid=(n, nhw),
                in_specs=[
                    pl.BlockSpec((1, c, thw), lambda i, j: (i, 0, j)),
                    pl.BlockSpec((c, cs), lambda i, j: (0, 0)),
                    pl.BlockSpec((1, cs), lambda i, j: (0, 0)),
                    pl.BlockSpec((cs, c), lambda i, j: (0, 0)),
                    pl.BlockSpec((1, c), lambda i, j: (0, 0)),
                ],
                out_specs=pl.BlockSpec((1, c, 1), lambda i, j: (i, 0, 0)),
                scratch_shapes=[pltpu.VMEM((1, c), jnp.float32)],
            ),
            compiler_params=pltpu.CompilerParams(
                dimension_semantics=("parallel", "arbitrary"),
                vmem_limit_bytes=vmem_limit),
            cost_estimate=cost_a,
        )(x_flat, w1t, b1r, w2t, b2r)

        # Pass B: gating multiply.
        cost_b = pl.CostEstimate(
            flops=int(n * c * hw),
            transcendentals=0,
            bytes_accessed=int(2 * n * c * hw * itemsize + n * c * 4))
        out = pl.pallas_call(
            _se_gate_kernel,
            out_shape=jax.ShapeDtypeStruct((n, c, hw), dtype),
            grid_spec=pltpu.PrefetchScalarGridSpec(
                num_scalar_prefetch=0,
                grid=(n, nhw),
                in_specs=[
                    pl.BlockSpec((1, c, thw), lambda i, j: (i, 0, j)),
                    pl.BlockSpec((1, c, 1), lambda i, j: (i, 0, 0)),
                ],
                out_specs=pl.BlockSpec((1, c, thw), lambda i, j: (i, 0, j)),
            ),
            compiler_params=pltpu.CompilerParams(
                dimension_semantics=("parallel", "parallel"),
                vmem_limit_bytes=vmem_limit),
            cost_estimate=cost_b,
            input_output_aliases=io_alias,
        )(x_flat, scale)

    return out.reshape(n, c, h, w)


# -------------------------------- reference ----------------------------------

def _reference(x, w1, b1, w2, b2):
    mean = jnp.mean(x, axis=(2, 3), keepdims=True)              # (N, C, 1, 1)
    h = jnp.einsum("sc,ncij->nsij", w1, mean) + b1[None, :, None, None]
    h = jax.nn.relu(h)
    s = jnp.einsum("cs,nsij->ncij", w2, h) + b2[None, :, None, None]
    s = jnp.clip((s + 3.0) / 6.0, 0.0, 1.0)                     # hardsigmoid
    return s * x


if __name__ == "__main__":
    key = jax.random.PRNGKey(0)

    def run_case(idx, n, c, h, w, **kwargs):
        cs = _make_divisible(c // 4, 8)
        kk = jax.random.fold_in(key, idx)
        kx, k1, k2, k3, k4 = jax.random.split(kk, 5)
        x = jax.random.normal(kx, (n, c, h, w), dtype=jnp.float32)
        w1 = jax.random.normal(k1, (cs, c), dtype=jnp.float32) * 0.1
        b1 = jax.random.normal(k2, (cs,), dtype=jnp.float32) * 0.1
        w2 = jax.random.normal(k3, (c, cs), dtype=jnp.float32) * 0.1
        b2 = jax.random.normal(k4, (c,), dtype=jnp.float32) * 0.1
        ref = _reference(x, w1, b1, w2, b2)
        out = jax.block_until_ready(squeeze_excitation(x, w1, b1, w2, b2, **kwargs))
        assert out.shape == x.shape and out.dtype == x.dtype
        assert jnp.allclose(out, ref, atol=1e-5, rtol=1e-5), f"case {idx} mismatch"

    # Module config input_c=4 (squeeze_c = 8): single-pass path.
    run_case(0, 2, 4, 16, 16)
    # Force the two-pass HW-tiled path (tiny budget); HW=225 exercises the tail mask.
    run_case(1, 3, 8, 15, 15, live_vmem_budget_bytes=1 << 10)
    # Ragged batch tiling in the single-pass path (N=5, bt=2 -> grid of 3, last partial).
    run_case(2, 5, 4, 8, 16, live_vmem_budget_bytes=16 << 10)

    print("KERNEL_OK")
</pallas_src>

<mosaic_0001>
module attributes {stable_mosaic.version = 11 : i64} {
  func.func @_se_kernel(%arg0: i32, %arg1: memref<2x4x256xf32, #tpu.memory_space<vmem>>, %arg2: memref<4x8xf32, #tpu.memory_space<vmem>>, %arg3: memref<1x8xf32, #tpu.memory_space<vmem>>, %arg4: memref<8x4xf32, #tpu.memory_space<vmem>>, %arg5: memref<1x4xf32, #tpu.memory_space<vmem>>, %arg6: memref<2x4x256xf32, #tpu.memory_space<vmem>>) attributes {dimension_semantics = [#tpu.dimension_semantics<parallel>], iteration_bounds = array<i64: 1>, scalar_prefetch = 0 : i64, scratch_operands = 0 : i64, tpu.core_type = #tpu.core_type<tc>, window_params = [{transform_indices = @transform_0, window_bounds = array<i64: 2, 4, 256>}, {pipeline_mode = #tpu.pipeline_mode<synchronous>, transform_indices = @transform_1, window_bounds = array<i64: 4, 8>}, {pipeline_mode = #tpu.pipeline_mode<synchronous>, transform_indices = @transform_2, window_bounds = array<i64: 1, 8>}, {pipeline_mode = #tpu.pipeline_mode<synchronous>, transform_indices = @transform_3, window_bounds = array<i64: 8, 4>}, {pipeline_mode = #tpu.pipeline_mode<synchronous>, transform_indices = @transform_4, window_bounds = array<i64: 1, 4>}, {transform_indices = @transform_5, window_bounds = array<i64: 2, 4, 256>}]} {
    %c0 = arith.constant 0 : index
    %c0_0 = arith.constant 0 : index
    %c0_1 = arith.constant 0 : index
    %0 = vector.load %arg1[%c0, %c0_0, %c0_1] : memref<2x4x256xf32, #tpu.memory_space<vmem>>, vector<2x4x256xf32>
    %cst = arith.constant dense<0.000000e+00> : vector<2x4xf32>
    %1 = vector.multi_reduction <add>, %0, %cst [2] : vector<2x4x256xf32> to vector<2x4xf32>
    %cst_2 = arith.constant 3.906250e-03 : f32
    %2 = vector.broadcast %cst_2 : f32 to vector<2x4xf32>
    %3 = arith.mulf %1, %2 : vector<2x4xf32>
    %c0_3 = arith.constant 0 : index
    %c0_4 = arith.constant 0 : index
    %4 = vector.load %arg2[%c0_3, %c0_4] : memref<4x8xf32, #tpu.memory_space<vmem>>, vector<4x8xf32>
    %cst_5 = arith.constant dense<0.000000e+00> : vector<2x8xf32>
    %5 = tpu.matmul %3, %4, %cst_5 {dimension_numbers = #tpu.dot_dimension_numbers<[1], [0], [0], [1], [0, 0, 1, 1], [], []>} : vector<2x4xf32>, vector<4x8xf32>, vector<2x8xf32> -> vector<2x8xf32>
    %c0_6 = arith.constant 0 : index
    %c0_7 = arith.constant 0 : index
    %6 = vector.load %arg3[%c0_6, %c0_7] : memref<1x8xf32, #tpu.memory_space<vmem>>, vector<1x8xf32>
    %7 = vector.broadcast %6 : vector<1x8xf32> to vector<2x8xf32>
    %8 = arith.addf %5, %7 : vector<2x8xf32>
    %cst_8 = arith.constant 0.000000e+00 : f32
    %9 = vector.broadcast %cst_8 : f32 to vector<2x8xf32>
    %10 = arith.maximumf %8, %9 : vector<2x8xf32>
    %c0_9 = arith.constant 0 : index
    %c0_10 = arith.constant 0 : index
    %11 = vector.load %arg4[%c0_9, %c0_10] : memref<8x4xf32, #tpu.memory_space<vmem>>, vector<8x4xf32>
    %cst_11 = arith.constant dense<0.000000e+00> : vector<2x4xf32>
    %12 = tpu.matmul %10, %11, %cst_11 {dimension_numbers = #tpu.dot_dimension_numbers<[1], [0], [0], [1], [0, 0, 1, 1], [], []>} : vector<2x8xf32>, vector<8x4xf32>, vector<2x4xf32> -> vector<2x4xf32>
    %c0_12 = arith.constant 0 : index
    %c0_13 = arith.constant 0 : index
    %13 = vector.load %arg5[%c0_12, %c0_13] : memref<1x4xf32, #tpu.memory_space<vmem>>, vector<1x4xf32>
    %14 = vector.broadcast %13 : vector<1x4xf32> to vector<2x4xf32>
    %15 = arith.addf %12, %14 : vector<2x4xf32>
    %cst_14 = arith.constant 3.000000e+00 : f32
    %16 = vector.broadcast %cst_14 : f32 to vector<2x4xf32>
    %17 = arith.addf %15, %16 : vector<2x4xf32>
    %cst_15 = arith.constant 0.166666672 : f32
    %18 = vector.broadcast %cst_15 : f32 to vector<2x4xf32>
    %19 = arith.mulf %17, %18 : vector<2x4xf32>
    %cst_16 = arith.constant 0.000000e+00 : f32
    %cst_17 = arith.constant 1.000000e+00 : f32
    %20 = vector.broadcast %cst_16 : f32 to vector<2x4xf32>
    %21 = arith.maximumf %20, %19 : vector<2x4xf32>
    %22 = vector.broadcast %cst_17 : f32 to vector<2x4xf32>
    %23 = arith.minimumf %22, %21 : vector<2x4xf32>
    %24 = vector.shape_cast %23 : vector<2x4xf32> to vector<2x4x1xf32>
    %25 = vector.broadcast %24 : vector<2x4x1xf32> to vector<2x4x256xf32>
    %26 = arith.mulf %0, %25 : vector<2x4x256xf32>
    %c0_18 = arith.constant 0 : index
    %c0_19 = arith.constant 0 : index
    %c0_20 = arith.constant 0 : index
    %27 = vector.load %arg6[%c0_18, %c0_19, %c0_20] : memref<2x4x256xf32, #tpu.memory_space<vmem>>, vector<2x4x256xf32>
    tpu.vector_store %arg6[%c0_18, %c0_19, %c0_20], %26 {strides = array<i32>} : memref<2x4x256xf32, #tpu.memory_space<vmem>>, vector<2x4x256xf32>,
    return
  }
  func.func @transform_0(%arg0: i32) -> (i32, i32, i32) {
    %c0_i32 = arith.constant 0 : i32
    %c0_i32_0 = arith.constant 0 : i32
    %c0_i32_1 = arith.constant 0 : i32
    return %arg0, %c0_i32, %c0_i32_0 : i32, i32, i32
  }
  func.func @transform_1(%arg0: i32) -> (i32, i32) {
    %c0_i32 = arith.constant 0 : i32
    %c0_i32_0 = arith.constant 0 : i32
    %c0_i32_1 = arith.constant 0 : i32
    return %c0_i32, %c0_i32_0 : i32, i32
  }
  func.func @transform_2(%arg0: i32) -> (i32, i32) {
    %c0_i32 = arith.constant 0 : i32
    %c0_i32_0 = arith.constant 0 : i32
    %c0_i32_1 = arith.constant 0 : i32
    return %c0_i32, %c0_i32_0 : i32, i32
  }
  func.func @transform_3(%arg0: i32) -> (i32, i32) {
    %c0_i32 = arith.constant 0 : i32
    %c0_i32_0 = arith.constant 0 : i32
    %c0_i32_1 = arith.constant 0 : i32
    return %c0_i32, %c0_i32_0 : i32, i32
  }
  func.func @transform_4(%arg0: i32) -> (i32, i32) {
    %c0_i32 = arith.constant 0 : i32
    %c0_i32_0 = arith.constant 0 : i32
    %c0_i32_1 = arith.constant 0 : i32
    return %c0_i32, %c0_i32_0 : i32, i32
  }
  func.func @transform_5(%arg0: i32) -> (i32, i32, i32) {
    %c0_i32 = arith.constant 0 : i32
    %c0_i32_0 = arith.constant 0 : i32
    %c0_i32_1 = arith.constant 0 : i32
    return %arg0, %c0_i32, %c0_i32_0 : i32, i32, i32
  }
}

</mosaic_0001>

<bundles_post_ra>
// kernel: tpu_custom_call.1
= control target key start
LH: loop header
LB: loop body
LE: loop exit
PB: predicated region body
PF: predicated region fallthrough
CT: control target
= control target key end

     0   :  { %10 = vsyncpa [#allocation3], 0  ;;  %s466_s0 = inlined_call_operand.hbm [shape: f32[2,4,256], index: 0, kind: input, shape index: {}]   ;;  %s467_s1 = inlined_call_operand.vmem [shape: f32[4,8], index: 1, kind: input, shape index: {}]   ;;  %s468_s2 = inlined_call_operand.vmem [shape: f32[1,8], index: 2, kind: input, shape index: {}]   ;;  %s469_s3 = inlined_call_operand.vmem [shape: f32[8,4], index: 3, kind: input, shape index: {}]   ;;  %s470_s4 = inlined_call_operand.vmem [shape: f32[1,4], index: 4, kind: input, shape index: {}]   ;;  %s471_s5 = inlined_call_operand.hbm [shape: f32[2,4,256], index: 5, kind: output, shape index: {}]  }
   0x1   :  { %11 = vsyncpa [#allocation4], 0  ;;  %s370_s18 = smov [#allocation2]   ;;  %s322_s22 = scalar_lea.hbm %s466_s0, 256 }
   0x2   :  { %s17_s19 = sshll.u32 %s370_s18, 4  ;;  %p323_p0 = scmp.ne.s32.totalorder %s466_s0, %s322_s22  ;;  %s18_s19 = int_to_ptr.vmem [resolvable:$true] %s17_s19 }
   0x3   :  { %p326_p1 = scmp.lt.u32.totalorder %s322_s22, %s466_s0 }
   0x5   :  { %p328_p2 = pnand %p326_p1, %p323_p0 }
   0x7   :  { %331 = shalt.err (!%p328_p2)
}
   0x8   :  { %s332_s27 = scalar_lea.vmem %s18_s19, 256  ;;  %p337_p4 = scmp.lt.s32.totalorder %s18_s19, %s18_s19 }
   0x9   :  { %p333_p3 = scmp.ne.s32.totalorder %s18_s19, %s332_s27  ;;  %p338_p5 = scmp.lt.s32.totalorder %s332_s27, %s332_s27 }
   0xb   :  { %p339_p6 = por %p338_p5, %p337_p4 }
   0xd   :  { %p340_p7 = pnand %p339_p6, %p333_p3 }
   0xf   :  { %343 = shalt.err (!%p340_p7)
}
  0x10   :  { %s371_s28 = smov 128   ;;  %s372_s29 = smov 8  }
  0x11   :  { %23 = dma.hbm_to_vmem [thread:$0]  %s466_s0, 256, %s18_s19, [#allocation3], %s371_s28, %s371_s28, %s372_s29  }
  0x12   :  { %366 = dma.done.wait [#allocation3], 256  }
  0x13   :  { %367 = vsyncadd [#allocation3], 4294967040  ;;  %vm43_vm0 = vcmask 1043456   ;;  %v422_v0 = vld [vmem:[#allocation2] sm:$0xff]  ;;  %v424_v1 = vld [vmem:[#allocation2 + $0x8] sm:$0xff]  ;;  %v373_v11 = vmov 0.0   ;;  %v66_v12 = vlaneseq }
  0x14   :  { %v39_v2 = vcombine.high %v422_v0, %v422_v0  ;;  %v44_v3 = vsel %vm43_vm0, %v422_v0, 0.0  ;;  %v40_v4 = vcombine.high %v424_v1, %v424_v1  ;;  %v49_v6 = vsel %vm43_vm0, %v424_v1, 0.0  ;;  %v56_v10 = vld [vmem:[%s467_s1] sm:$0xf]  ;;  %303 = vmatprep.subr.mxu0 %v373_v11  ;;  %308 = vmatprep.subr.mxu1 %v373_v11 }
  0x15   :  { %vm374_vm1 = vmmov 0   ;;  %304 = vmatpush3.msk.msra.mxu0 %vm43_vm0, %v56_v10  ;;  %v67_v13 = vand.u32 127, %v66_v12  ;;  %v69_v14 = vshrl.u32 %v66_v12, 7  ;;  %vm76_vm2 = vcmask 1041409   ;;  %v155_v23 = vld [vmem:[%s469_s3] sm:$0xff] }
  0x16   :  { %v45_v5 = vsel %vm43_vm0, %v39_v2, 0.0  ;;  %v50_v7 = vsel %vm43_vm0, %v40_v4, 0.0  ;;  %305 = vmatprep.mubr.msk.f32.mxu0 %vm374_vm1, %v373_v11  ;;  %310 = vmatprep.mubr.msk.f32.mxu1 %vm374_vm1, %v373_v11  ;;  %vm78_vm3 = vcmask 31744   ;;  %v294_v24 = vld [vmem:[%s468_s2] ss:$0 sm:$0xff]  ;;  %vm163_vm4 = vcmask 64512  }
  0x17   :  { %v46_v8 = vadd.f32 %v45_v5, %v44_v3  ;;  %v51_v9 = vadd.f32 %v50_v7, %v49_v6  ;;  %v70_v16 = vsub.s32 %v67_v13, %v69_v14  ;;  %309 = vmatpush3.msra.mxu1 %v155_v23  ;;  %v297_v29 = vld [vmem:[%s470_s4] ss:$0 sm:$0xff]  ;;  %v243_v36 = vsub.s32 0, %v69_v14  ;;  %s376_s2 = smov [#allocation5]  }
  0x18   :  { %v250_v39 = vsub.s32 1, %v69_v14  ;;  %v375_v41 = vmov 839922192   ;;  %s282_s3 = sshll.u32 %s376_s2, 4  ;;  %s283_s3 = int_to_ptr.vmem [resolvable:$true] %s282_s3 }
  0x19   :  { %47 = vadd.xlane.f32.xlu0 %v46_v8  ;;  %v258_v42 = vunpack.c.l.s4 %v375_v41  ;;  %s344_s4 = scalar_lea.vmem %s283_s3, 256  ;;  %p349_p9 = scmp.lt.s32.totalorder %s283_s3, %s283_s3 }
  0x1a   :  { %p345_p8 = scmp.ne.s32.totalorder %s283_s3, %s344_s4  ;;  %p350_p10 = scmp.lt.s32.totalorder %s344_s4, %s344_s4 }
  0x1b   :  { %v259_v43 = vunpack.c.0.s8 %v258_v42 }
  0x1c   :  { %p351_p11 = por %p350_p10, %p349_p9 }
  0x1d   :  { %52 = vadd.xlane.f32.xlu0 %v51_v9  ;;  %v262_v44 = vsub.s32 %v259_v43, %v69_v14 }
  0x1e   :  { %p352_p12 = pnand %p351_p11, %p345_p8 }
  0xa6   :  { %v48_v15 = vpop.xlane.xlu0 %47 }
  0xa7   :  { %v54_v17 = vmul.f32 0.00390625, %v48_v15 }
  0xa9   :  { %v71_v20 = vrot.slane %v54_v17, %v70_v16 }
  0xaa   :  { %v53_v18 = vpop.xlane.xlu0 %52 }
  0xab   :  { %v55_v19 = vmul.f32 0.00390625, %v53_v18 }
  0xad   :  { %v75_v21 = vrot.slane %v55_v19, %v70_v16 }
  0xaf   :  { %v77_v22 = vsel %vm76_vm2, %v75_v21, %v71_v20 }
  0xb0   :  { %306 = vmatmul.mubr.msk.f32.vlgmr.msra.gmra.mrb[0].mxu0 %vm78_vm3, %v77_v22 }
 0x183   :  { %v150_v25 = vpop.f32.mrb[0].mxu0 }
 0x184   :  { %v151_v26 = vadd.f32 %v294_v24, %v150_v25  ;;  %v307_v27 = vpop.f32.mrb[1].mxu0 }
 0x186   :  { %v154_v28 = vmax.f32 %v151_v26, 0.0 }
 0x188   :  { %311 = vmatmul.mubr.msk.f32.vlgmr.msra.gmra.mrb[0].mxu1 %vm163_vm4, %v154_v28 }
 0x25b   :  { %v233_v30 = vpop.f32.mrb[0].mxu1 }
 0x25c   :  { %v234_v31 = vadd.f32 %v297_v29, %v233_v30  ;;  %v312_v32 = vpop.f32.mrb[1].mxu1 }
 0x25e   :  { %v237_v33 = vadd.f32 3.0, %v234_v31 }
 0x260   :  { %v238_v34 = vmul.f32 0.16666667, %v237_v33 }
 0x262   :  { %v239_v35 = vmax.f32 %v238_v34, 0.0 }
 0x264   :  { %v240_v37 = vmin.f32 %v239_v35, 1.0 }
 0x266   :  { %v244_v38 = vrot.slane %v240_v37, %v243_v36  ;;  %v251_v40 = vrot.slane %v240_v37, %v250_v39 }
 0x268   :  { %246 = vbcast.lane.b32.xlu1 %v244_v38, 256 }
 0x26c   :  { %253 = vbcast.lane.b32.xlu1 %v251_v40, 256 }
 0x2da   :  { %v247_v45 = vpop.permute.xlu1 %246 }
 0x2db   :  { %v263_v46 = vrot.slane %v247_v45, %v262_v44 }
 0x2dd   :  { %v273_v47 = vmul.f32 %v263_v46, %v422_v0 }
 0x2de   :  { %v254_v48 = vpop.permute.xlu1 %253 }
 0x2df   :  { %275 = vst [vmem:[#allocation5] sm:$0xff] %v273_v47  ;;  %v270_v49 = vrot.slane %v254_v48, %v262_v44 }
 0x2e1   :  { %v274_v50 = vmul.f32 %v270_v49, %v424_v1 }
 0x2e3   :  { %276 = vst [vmem:[#allocation5 + $0x8] sm:$0xff] %v274_v50 }
 0x2e4   :  { %355 = shalt.err (!%p352_p12)
}
 0x2e5   :  { %s356_s15 = scalar_lea.hbm %s471_s5, 256 }
 0x2e6   :  { %p357_p13 = scmp.ne.s32.totalorder %s471_s5, %s356_s15  ;;  %p360_p0 = scmp.lt.u32.totalorder %s356_s15, %s471_s5 }
 0x2e8   :  { %p362_p1 = pnand %p360_p0, %p357_p13 }
 0x2ea   :  { %365 = shalt.err (!%p362_p1)
}
 0x2eb   :  { %288 = dma.vmem_to_hbm [thread:$0]  %s283_s3, 256, %s471_s5, [#allocation4], %s371_s28, %s371_s28, %s372_s29  }
 0x2ec   :  { %368 = dma.done.wait [#allocation4], 256  }
 0x2ed   :  { %369 = vsyncadd [#allocation4], 4294967040 }
 0x2ee   :  { %292 = vsyncpa [#allocation3], 1 }
 0x2ef   :  { %293 = vsyncpa [#allocation4], 1 }

</bundles_post_ra>
